<compile_context>
chip_gen: v7x
topology: tpu7x:2x2x1
jax: 0.10.0
libtpu: 0.0.40
codegen_flags: <defaults>
</compile_context>

<pallas_src>
import functools

import jax
import jax.numpy as jnp
from jax.experimental import pallas as pl
from jax.experimental.pallas import tpu as pltpu

SUBLANE = 8
# Conservative working-set budget: fits v5e's 16 MiB default scoped VMEM,
# leaves plenty of headroom on v6e (32 MiB default) and v7x (32 MiB default,
# 64 MiB physical). Raise together with pltpu.CompilerParams(vmem_limit_bytes=)
# if sweeping tile_b past ~5k rows.
_VMEM_BUDGET_BYTES = 12 << 20


def _round_up(x, m):
    return ((x + m - 1) // m) * m


def decoder1_kernel(z_ref, w1_ref, b1_ref, w2_ref, b2_ref, w3_ref, b3_ref,
                    o_ref):
    # Layer 1: Linear + ReLU (f32 in, f32 accumulate)
    h = jnp.dot(z_ref[...], w1_ref[...],
                preferred_element_type=jnp.float32) + b1_ref[...]
    h = jnp.maximum(h, 0.0)

    # Layer 2: Linear + ReLU
    h = jnp.dot(h, w2_ref[...],
                preferred_element_type=jnp.float32) + b2_ref[...]
    h = jnp.maximum(h, 0.0)

    # Layer 3: Linear + Sigmoid (logistic lowers to the EUP slot)
    h = jnp.dot(h, w3_ref[...],
                preferred_element_type=jnp.float32) + b3_ref[...]
    o_ref[...] = jax.nn.sigmoid(h).astype(o_ref.dtype)


def _choose_tile(B, tile_b, latent, h1, h2, out_size):
    """Pick a batch tile: multiple of 8, VMEM-bounded, >=2 grid steps when big."""
    tb = min(int(tile_b), _round_up(B, SUBLANE))
    # v7x megacore: keep at least 2 grid steps so both TensorCores get work.
    if B >= 4 * SUBLANE:
        tb = min(tb, _round_up(pl.cdiv(B, 2), SUBLANE))
    # VMEM clamp: double-buffered z/out tiles + f32 intermediates per row.
    per_row_bytes = 4 * (2 * latent + 3 * out_size + h1 + h2)
    vmem_cap_rows = max(SUBLANE,
                        (_VMEM_BUDGET_BYTES // per_row_bytes) // SUBLANE * SUBLANE)
    tb = min(tb, vmem_cap_rows)
    # (8,128) rule: sublane dim of the block must be a multiple of 8.
    tb = max(SUBLANE, (tb // SUBLANE) * SUBLANE)
    return tb


@functools.partial(jax.jit, static_argnames=("tile_b", "out_dtype"))
def decoder1_forward(z, params, *, tile_b=2048, out_dtype=jnp.float32):
    """z: (B, latent_size) f32 -> (B, out_size) out_dtype (default f32).

    Pass out_dtype=jnp.bfloat16 if downstream consumers accept bf16 — the
    f32 output stream dominates HBM bytes, so that halves total traffic.
    """
    w1, b1, w2, b2, w3, b3 = params
    B, latent = z.shape
    h1 = w1.shape[1]
    h2 = w2.shape[1]
    out_size = w3.shape[1]

    tb = _choose_tile(B, tile_b, latent, h1, h2, out_size)
    grid = (pl.cdiv(B, tb),)

    # Streamed operands: tiled along batch (double-buffered by BlockSpec).
    stream_spec = lambda feat: pl.BlockSpec((tb, feat), lambda i: (i, 0))
    # Resident operands: constant block index -> DMA'd once, live in VMEM.
    resident_spec = lambda a: pl.BlockSpec(a.shape, lambda i: (0, 0))

    flops = 2 * B * (latent * h1 + h1 * h2 + h2 * out_size)
    bytes_accessed = (
        z.size * z.dtype.itemsize
        + sum(a.size * a.dtype.itemsize for a in params)
        + B * out_size * jnp.dtype(out_dtype).itemsize)

    return pl.pallas_call(
        decoder1_kernel,
        out_shape=jax.ShapeDtypeStruct((B, out_size), out_dtype),
        grid=grid,
        in_specs=[
            stream_spec(latent),
            resident_spec(w1), resident_spec(b1),
            resident_spec(w2), resident_spec(b2),
            resident_spec(w3), resident_spec(b3),
        ],
        out_specs=stream_spec(out_size),
        compiler_params=pltpu.CompilerParams(
            dimension_semantics=("parallel",)),
        cost_estimate=pl.CostEstimate(
            flops=flops,
            transcendentals=B * out_size,
            bytes_accessed=bytes_accessed),
    )(z, w1, b1, w2, b2, w3, b3)


def init_decoder1_params(key, latent_size, out_size):
    """Deterministic init mimicking PyTorch nn.Linear default U(-1/sqrt(fan_in), +)."""
    h1 = out_size // 4
    h2 = out_size // 2
    dims = [(latent_size, h1), (h1, h2), (h2, out_size)]
    params = []
    for (fan_in, fan_out) in dims:
        key, kw, kb = jax.random.split(key, 3)
        bound = 1.0 / jnp.sqrt(float(fan_in))
        # stored pre-transposed: (in_features, out_features)
        w = jax.random.uniform(kw, (fan_in, fan_out), jnp.float32, -bound, bound)
        b = jax.random.uniform(kb, (1, fan_out), jnp.float32, -bound, bound)
        params.extend([w, b])
    return tuple(params)


def decoder1_reference(z, params):
    """Pure-JAX f32 reference for correctness check."""
    w1, b1, w2, b2, w3, b3 = params
    h = jnp.maximum(z @ w1 + b1, 0.0)
    h = jnp.maximum(h @ w2 + b2, 0.0)
    return jax.nn.sigmoid(h @ w3 + b3)


if __name__ == "__main__":
    key = jax.random.PRNGKey(0)
    k_small, k_big, k_par = jax.random.split(key, 3)

    latent_size = 32
    out_size = 128  # -> hidden sizes 32 and 64
    params = init_decoder1_params(k_par, latent_size, out_size)

    # All-f32 pipeline; tolerance covers MXU vs XLA-default matmul rounding.
    TOL = 1e-2

    # Small batch (module-scale demo): single grid step, partial-lane-free.
    batch = 8
    z = jax.random.normal(k_small, (batch, latent_size), jnp.float32)
    out = jax.block_until_ready(decoder1_forward(z, params))
    ref = decoder1_reference(z, params)
    assert out.shape == (batch, out_size)
    assert jnp.allclose(out, ref, atol=TOL, rtol=0.0), "mismatch (small batch)"

    # Larger ragged batch: exercises >=2 grid steps (v7x megacore path) and a
    # masked partial last batch tile (no wrapper-side padding or slicing).
    batch_big = 1000
    z_big = jax.random.normal(k_big, (batch_big, latent_size), jnp.float32)
    out_big = jax.block_until_ready(decoder1_forward(z_big, params))
    ref_big = decoder1_reference(z_big, params)
    assert out_big.shape == (batch_big, out_size)
    assert jnp.allclose(out_big, ref_big, atol=TOL, rtol=0.0), "mismatch (big batch)"

    print("KERNEL_OK")
</pallas_src>

<mosaic_0001>
module attributes {stable_mosaic.version = 11 : i64} {
  func.func @decoder1_kernel(%arg0: i32, %arg1: memref<8x32xf32, #tpu.memory_space<vmem>>, %arg2: memref<32x32xf32, #tpu.memory_space<vmem>>, %arg3: memref<1x32xf32, #tpu.memory_space<vmem>>, %arg4: memref<32x64xf32, #tpu.memory_space<vmem>>, %arg5: memref<1x64xf32, #tpu.memory_space<vmem>>, %arg6: memref<64x128xf32, #tpu.memory_space<vmem>>, %arg7: memref<1x128xf32, #tpu.memory_space<vmem>>, %arg8: memref<8x128xf32, #tpu.memory_space<vmem>>) attributes {dimension_semantics = [#tpu.dimension_semantics<parallel>], iteration_bounds = array<i64: 1>, scalar_prefetch = 0 : i64, scratch_operands = 0 : i64, tpu.core_type = #tpu.core_type<tc>, window_params = [{transform_indices = @transform_0, window_bounds = array<i64: 8, 32>}, {pipeline_mode = #tpu.pipeline_mode<synchronous>, transform_indices = @transform_1, window_bounds = array<i64: 32, 32>}, {pipeline_mode = #tpu.pipeline_mode<synchronous>, transform_indices = @transform_2, window_bounds = array<i64: 1, 32>}, {pipeline_mode = #tpu.pipeline_mode<synchronous>, transform_indices = @transform_3, window_bounds = array<i64: 32, 64>}, {pipeline_mode = #tpu.pipeline_mode<synchronous>, transform_indices = @transform_4, window_bounds = array<i64: 1, 64>}, {pipeline_mode = #tpu.pipeline_mode<synchronous>, transform_indices = @transform_5, window_bounds = array<i64: 64, 128>}, {pipeline_mode = #tpu.pipeline_mode<synchronous>, transform_indices = @transform_6, window_bounds = array<i64: 1, 128>}, {transform_indices = @transform_7, window_bounds = array<i64: 8, 128>}]} {
    %c0 = arith.constant 0 : index
    %c0_0 = arith.constant 0 : index
    %0 = vector.load %arg1[%c0, %c0_0] : memref<8x32xf32, #tpu.memory_space<vmem>>, vector<8x32xf32>
    %c0_1 = arith.constant 0 : index
    %c0_2 = arith.constant 0 : index
    %1 = vector.load %arg2[%c0_1, %c0_2] : memref<32x32xf32, #tpu.memory_space<vmem>>, vector<32x32xf32>
    %cst = arith.constant dense<0.000000e+00> : vector<8x32xf32>
    %2 = tpu.matmul %0, %1, %cst {dimension_numbers = #tpu.dot_dimension_numbers<[1], [0], [0], [1], [0, 0, 1, 1], [], []>} : vector<8x32xf32>, vector<32x32xf32>, vector<8x32xf32> -> vector<8x32xf32>
    %c0_3 = arith.constant 0 : index
    %c0_4 = arith.constant 0 : index
    %3 = vector.load %arg3[%c0_3, %c0_4] : memref<1x32xf32, #tpu.memory_space<vmem>>, vector<1x32xf32>
    %4 = vector.broadcast %3 : vector<1x32xf32> to vector<8x32xf32>
    %5 = arith.addf %2, %4 : vector<8x32xf32>
    %cst_5 = arith.constant 0.000000e+00 : f32
    %6 = vector.broadcast %cst_5 : f32 to vector<8x32xf32>
    %7 = arith.maximumf %5, %6 : vector<8x32xf32>
    %c0_6 = arith.constant 0 : index
    %c0_7 = arith.constant 0 : index
    %8 = vector.load %arg4[%c0_6, %c0_7] : memref<32x64xf32, #tpu.memory_space<vmem>>, vector<32x64xf32>
    %cst_8 = arith.constant dense<0.000000e+00> : vector<8x64xf32>
    %9 = tpu.matmul %7, %8, %cst_8 {dimension_numbers = #tpu.dot_dimension_numbers<[1], [0], [0], [1], [0, 0, 1, 1], [], []>} : vector<8x32xf32>, vector<32x64xf32>, vector<8x64xf32> -> vector<8x64xf32>
    %c0_9 = arith.constant 0 : index
    %c0_10 = arith.constant 0 : index
    %10 = vector.load %arg5[%c0_9, %c0_10] : memref<1x64xf32, #tpu.memory_space<vmem>>, vector<1x64xf32>
    %11 = vector.broadcast %10 : vector<1x64xf32> to vector<8x64xf32>
    %12 = arith.addf %9, %11 : vector<8x64xf32>
    %cst_11 = arith.constant 0.000000e+00 : f32
    %13 = vector.broadcast %cst_11 : f32 to vector<8x64xf32>
    %14 = arith.maximumf %12, %13 : vector<8x64xf32>
    %c0_12 = arith.constant 0 : index
    %c0_13 = arith.constant 0 : index
    %15 = vector.load %arg6[%c0_12, %c0_13] : memref<64x128xf32, #tpu.memory_space<vmem>>, vector<64x128xf32>
    %cst_14 = arith.constant dense<0.000000e+00> : vector<8x128xf32>
    %16 = tpu.matmul %14, %15, %cst_14 {dimension_numbers = #tpu.dot_dimension_numbers<[1], [0], [0], [1], [0, 0, 1, 1], [], []>} : vector<8x64xf32>, vector<64x128xf32>, vector<8x128xf32> -> vector<8x128xf32>
    %c0_15 = arith.constant 0 : index
    %c0_16 = arith.constant 0 : index
    %17 = vector.load %arg7[%c0_15, %c0_16] : memref<1x128xf32, #tpu.memory_space<vmem>>, vector<1x128xf32>
    %18 = vector.broadcast %17 : vector<1x128xf32> to vector<8x128xf32>
    %19 = arith.addf %16, %18 : vector<8x128xf32>
    %20 = arith.negf %19 : vector<8x128xf32>
    %21 = math.exp %20 : vector<8x128xf32>
    %cst_17 = arith.constant 1.000000e+00 : f32
    %22 = vector.broadcast %cst_17 : f32 to vector<8x128xf32>
    %23 = arith.addf %22, %21 : vector<8x128xf32>
    %24 = arith.divf %22, %23 : vector<8x128xf32>
    %c0_18 = arith.constant 0 : index
    %c0_19 = arith.constant 0 : index
    %25 = vector.load %arg8[%c0_18, %c0_19] : memref<8x128xf32, #tpu.memory_space<vmem>>, vector<8x128xf32>
    tpu.vector_store %arg8[%c0_18, %c0_19], %24 {strides = array<i32>} : memref<8x128xf32, #tpu.memory_space<vmem>>, vector<8x128xf32>,
    return
  }
  func.func @transform_0(%arg0: i32) -> (i32, i32) {
    %c0_i32 = arith.constant 0 : i32
    %c0_i32_0 = arith.constant 0 : i32
    return %arg0, %c0_i32 : i32, i32
  }
  func.func @transform_1(%arg0: i32) -> (i32, i32) {
    %c0_i32 = arith.constant 0 : i32
    %c0_i32_0 = arith.constant 0 : i32
    %c0_i32_1 = arith.constant 0 : i32
    return %c0_i32, %c0_i32_0 : i32, i32
  }
  func.func @transform_2(%arg0: i32) -> (i32, i32) {
    %c0_i32 = arith.constant 0 : i32
    %c0_i32_0 = arith.constant 0 : i32
    %c0_i32_1 = arith.constant 0 : i32
    return %c0_i32, %c0_i32_0 : i32, i32
  }
  func.func @transform_3(%arg0: i32) -> (i32, i32) {
    %c0_i32 = arith.constant 0 : i32
    %c0_i32_0 = arith.constant 0 : i32
    %c0_i32_1 = arith.constant 0 : i32
    return %c0_i32, %c0_i32_0 : i32, i32
  }
  func.func @transform_4(%arg0: i32) -> (i32, i32) {
    %c0_i32 = arith.constant 0 : i32
    %c0_i32_0 = arith.constant 0 : i32
    %c0_i32_1 = arith.constant 0 : i32
    return %c0_i32, %c0_i32_0 : i32, i32
  }
  func.func @transform_5(%arg0: i32) -> (i32, i32) {
    %c0_i32 = arith.constant 0 : i32
    %c0_i32_0 = arith.constant 0 : i32
    %c0_i32_1 = arith.constant 0 : i32
    return %c0_i32, %c0_i32_0 : i32, i32
  }
  func.func @transform_6(%arg0: i32) -> (i32, i32) {
    %c0_i32 = arith.constant 0 : i32
    %c0_i32_0 = arith.constant 0 : i32
    %c0_i32_1 = arith.constant 0 : i32
    return %c0_i32, %c0_i32_0 : i32, i32
  }
  func.func @transform_7(%arg0: i32) -> (i32, i32) {
    %c0_i32 = arith.constant 0 : i32
    %c0_i32_0 = arith.constant 0 : i32
    return %arg0, %c0_i32 : i32, i32
  }
}

</mosaic_0001>

<bundles_post_ra>
// kernel: decoder1_forward.1
= control target key start
LH: loop header
LB: loop body
LE: loop exit
PB: predicated region body
PF: predicated region fallthrough
CT: control target
= control target key end

     0   :  { %12 = vsyncpa [#allocation3], 0  ;;  %s721_s0 = inlined_call_operand.hbm [shape: f32[8,32], index: 0, kind: input, shape index: {}]   ;;  %s722_s1 = inlined_call_operand.hbm [shape: f32[32,32], index: 1, kind: input, shape index: {}]   ;;  %s723_s2 = inlined_call_operand.vmem [shape: f32[1,32], index: 2, kind: input, shape index: {}]   ;;  %s724_s3 = inlined_call_operand.hbm [shape: f32[32,64], index: 3, kind: input, shape index: {}]   ;;  %s725_s4 = inlined_call_operand.vmem [shape: f32[1,64], index: 4, kind: input, shape index: {}]   ;;  %s726_s5 = inlined_call_operand.hbm [shape: f32[64,128], index: 5, kind: input, shape index: {}]   ;;  %s727_s6 = inlined_call_operand.vmem [shape: f32[1,128], index: 6, kind: input, shape index: {}]   ;;  %s728_s7 = inlined_call_operand.hbm [shape: f32[8,128], index: 7, kind: output, shape index: {}]  }
   0x1   :  { %13 = vsyncpa [#allocation6], 0 }
   0x2   :  { %14 = vsyncpa [#allocation9], 0 }
   0x3   :  { %15 = vsyncpa [#allocation4], 0  ;;  %s588_s24 = smov [#allocation5]   ;;  %s470_s28 = scalar_lea.hbm %s722_s1, 512 }
   0x4   :  { %s31_s25 = sshll.u32 %s588_s24, 4  ;;  %p471_p0 = scmp.ne.s32.totalorder %s722_s1, %s470_s28  ;;  %s32_s25 = int_to_ptr.vmem [resolvable:$true] %s31_s25 }
   0x5   :  { %p474_p1 = scmp.lt.u32.totalorder %s470_s28, %s722_s1 }
   0x7   :  { %p476_p2 = pnand %p474_p1, %p471_p0 }
   0x9   :  { %479 = shalt.err (!%p476_p2)
}
   0xa   :  { %s480_s10 = scalar_lea.vmem %s32_s25, 512  ;;  %p485_p4 = scmp.lt.s32.totalorder %s32_s25, %s32_s25 }
   0xb   :  { %p481_p3 = scmp.ne.s32.totalorder %s32_s25, %s480_s10  ;;  %p486_p5 = scmp.lt.s32.totalorder %s480_s10, %s480_s10 }
   0xd   :  { %p487_p6 = por %p486_p5, %p485_p4 }
   0xf   :  { %p488_p7 = pnand %p487_p6, %p481_p3 }
  0x11   :  { %491 = shalt.err (!%p488_p7)
}
  0x12   :  { %s589_s11 = smov 128   ;;  %s590_s12 = smov 8  }
  0x13   :  { %37 = dma.hbm_to_vmem [thread:$0]  %s722_s1, 512, %s32_s25, [#allocation6], %s589_s11, %s589_s11, %s590_s12  }
  0x14   :  { %s591_s15 = smov [#allocation2]   ;;  %s592_s17 = smov [#allocation7]  }
  0x15   :  { %s22_s16 = sshll.u32 %s591_s15, 4  ;;  %s45_s18 = sshll.u32 %s592_s17, 4  ;;  %s23_s16 = int_to_ptr.vmem [resolvable:$true] %s22_s16  ;;  %s46_s18 = int_to_ptr.vmem [resolvable:$true] %s45_s18 }
  0x16   :  { %s492_s21 = scalar_lea.hbm %s721_s0, 128 }
  0x17   :  { %p493_p8 = scmp.ne.s32.totalorder %s721_s0, %s492_s21  ;;  %p496_p9 = scmp.lt.u32.totalorder %s492_s21, %s721_s0 }
  0x19   :  { %p498_p10 = pnand %p496_p9, %p493_p8 }
  0x1b   :  { %501 = shalt.err (!%p498_p10)
}
  0x1c   :  { %s502_s1 = scalar_lea.vmem %s23_s16, 128  ;;  %p507_p12 = scmp.lt.s32.totalorder %s23_s16, %s23_s16 }
  0x1d   :  { %p503_p11 = scmp.ne.s32.totalorder %s23_s16, %s502_s1  ;;  %p508_p13 = scmp.lt.s32.totalorder %s502_s1, %s502_s1 }
  0x1f   :  { %p509_p0 = por %p508_p13, %p507_p12 }
  0x21   :  { %p510_p1 = pnand %p509_p0, %p503_p11 }
  0x23   :  { %513 = shalt.err (!%p510_p1)
}
  0x24   :  { %25 = dma.hbm_to_vmem [thread:$0]  %s721_s0, 128, %s23_s16, [#allocation3]  }
  0x25   :  { %s514_s30 = scalar_lea.hbm %s724_s3, 512 }
  0x26   :  { %p515_p2 = scmp.ne.s32.totalorder %s724_s3, %s514_s30  ;;  %p518_p3 = scmp.lt.u32.totalorder %s514_s30, %s724_s3 }
  0x28   :  { %p520_p4 = pnand %p518_p3, %p515_p2 }
  0x2a   :  { %523 = shalt.err (!%p520_p4)
}
  0x2b   :  { %s524_s14 = scalar_lea.vmem %s46_s18, 512  ;;  %p529_p6 = scmp.lt.s32.totalorder %s46_s18, %s46_s18 }
  0x2c   :  { %p525_p5 = scmp.ne.s32.totalorder %s46_s18, %s524_s14  ;;  %p530_p7 = scmp.lt.s32.totalorder %s524_s14, %s524_s14 }
  0x2e   :  { %p531_p8 = por %p530_p7, %p529_p6 }
  0x30   :  { %p532_p9 = pnand %p531_p8, %p525_p5 }
  0x32   :  { %535 = shalt.err (!%p532_p9)
}
  0x33   :  { %51 = dma.hbm_to_vmem [thread:$0]  %s724_s3, 512, %s46_s18, [#allocation6], %s589_s11, %s589_s11, %s590_s12  }
  0x34   :  { %s593_s16 = smov [#allocation8]   ;;  %s536_s21 = scalar_lea.hbm %s726_s5, 1024 }
  0x35   :  { %s59_s17 = sshll.u32 %s593_s16, 4  ;;  %p537_p10 = scmp.ne.s32.totalorder %s726_s5, %s536_s21  ;;  %s60_s17 = int_to_ptr.vmem [resolvable:$true] %s59_s17 }
  0x36   :  { %p540_p11 = scmp.lt.u32.totalorder %s536_s21, %s726_s5 }
  0x38   :  { %p542_p12 = pnand %p540_p11, %p537_p10 }
  0x3a   :  { %545 = shalt.err (!%p542_p12)
}
  0x3b   :  { %s546_s1 = scalar_lea.vmem %s60_s17, 1024  ;;  %p551_p0 = scmp.lt.s32.totalorder %s60_s17, %s60_s17 }
  0x3c   :  { %p547_p13 = scmp.ne.s32.totalorder %s60_s17, %s546_s1  ;;  %p552_p1 = scmp.lt.s32.totalorder %s546_s1, %s546_s1 }
  0x3e   :  { %p553_p2 = por %p552_p1, %p551_p0 }
  0x40   :  { %p554_p3 = pnand %p553_p2, %p547_p13 }
  0x42   :  { %557 = shalt.err (!%p554_p3)
}
  0x43   :  { %65 = dma.hbm_to_vmem [thread:$0]  %s726_s5, 1024, %s60_s17, [#allocation9], %s589_s11, %s589_s11, %s590_s12  }
  0x44   :  { %580 = dma.done.wait [#allocation3], 128  }
  0x45   :  { %581 = vsyncadd [#allocation3], 4294967168 }
  0x46   :  { %582 = dma.done.wait [#allocation6], 1024  }
  0x47   :  { %583 = vsyncadd [#allocation6], 4294966272 }
  0x48   :  { %584 = dma.done.wait [#allocation9], 1024  }
  0x49   :  { %585 = vsyncadd [#allocation9], 4294966272  ;;  %v594_v0 = vmov 0.0|0.0   ;;  %vm595_vm0 = vmmov 0   ;;  %v596_v1 = vmov 0.0   ;;  %v81_v2 = vld [vmem:[#allocation5] sm:$0xff] }
  0x4a   :  { %432 = vmatprep.subr.bf16.mxu1 %v594_v0  ;;  %399 = vmatprep.mubr.msk.f32.mxu1 %vm595_vm0, %v596_v1  ;;  %v82_v3 = vld [vmem:[#allocation5 + $0x8] sm:$0xff]  ;;  %v83_v4 = vld [vmem:[#allocation5 + $0x10] sm:$0xff]  ;;  %v84_v6 = vld [vmem:[#allocation5 + $0x18] sm:$0xff]  ;;  %vm92_vm1 = vcmask 261120   ;;  %vm267_vm2 = vcmask 523264   ;;  %s597_s28 = smov [#allocation10]  }
  0x4b   :  { %444 = vmatprep.subr.bf16.mxu0 %v594_v0  ;;  %429 = vmatprep.mubr.msk.f32.mxu0 %vm595_vm0, %v596_v1  ;;  %v433_v5 = vpack.c.bf16 %v82_v3, %v81_v2  ;;  %v436_v7 = vpack.c.bf16 %v84_v6, %v83_v4  ;;  %v167_v8 = vld [vmem:[#allocation7] sm:$0xff]  ;;  %v168_v9 = vld [vmem:[#allocation7 + $0x8] sm:$0xff]  ;;  %v80_v10 = vld [vmem:[#allocation2] sm:$0xff] }
  0x4c   :  { %v439_v11 = vpack.c.bf16 %v168_v9, %v167_v8  ;;  %v169_v12 = vld [vmem:[#allocation7 + $0x10] sm:$0xff]  ;;  %v170_v13 = vld [vmem:[#allocation7 + $0x18] sm:$0xff]  ;;  %v252_v15 = vld [vmem:[#allocation8] sm:$0xff] }
  0x4d   :  { %434 = vmatpush3.bf16.msra.mxu1 %v433_v5  ;;  %v442_v14 = vpack.c.bf16 %v170_v13, %v169_v12  ;;  %v253_v16 = vld [vmem:[#allocation8 + $0x8] sm:$0xff]  ;;  %v254_v17 = vld [vmem:[#allocation8 + $0x10] sm:$0xff]  ;;  %v255_v19 = vld [vmem:[#allocation8 + $0x18] sm:$0xff] }
  0x4e   :  { %435 = vmatprep.subr.bf16.mxu1 %v594_v0  ;;  %v445_v18 = vpack.c.bf16 %v253_v16, %v252_v15  ;;  %v448_v20 = vpack.c.bf16 %v255_v19, %v254_v17  ;;  %v256_v21 = vld [vmem:[#allocation8 + $0x20] sm:$0xff]  ;;  %v257_v22 = vld [vmem:[#allocation8 + $0x28] sm:$0xff]  ;;  %v365_v24 = vld [vmem:[%s723_s2] ss:$0 sm:$0xff] }
  0x4f   :  { %v451_v23 = vpack.c.bf16 %v257_v22, %v256_v21  ;;  %v258_v29 = vld [vmem:[#allocation8 + $0x30] sm:$0xff]  ;;  %v259_v30 = vld [vmem:[#allocation8 + $0x38] sm:$0xff] }
  0x50   :  { %446 = vmatpush3.bf16.msra.mxu0 %v445_v18  ;;  %v454_v31 = vpack.c.bf16 %v259_v30, %v258_v29  ;;  %v367_v32 = vld [vmem:[%s725_s4] ss:$0 sm:$0xff]  ;;  %s354_s4 = sshll.u32 %s597_s28, 4  ;;  %s355_s4 = int_to_ptr.vmem [resolvable:$true] %s354_s4 }
  0x51   :  { %437 = vmatpush3.bf16.msra.mxu1 %v436_v7  ;;  %447 = vmatprep.subr.bf16.mxu0 %v594_v0  ;;  %v369_v37 = vld [vmem:[%s727_s6] ss:$0 sm:$0xff]  ;;  %s558_s29 = scalar_lea.vmem %s355_s4, 128  ;;  %p563_p5 = scmp.lt.s32.totalorder %s355_s4, %s355_s4 }
  0x52   :  { %438 = vmatprep.subr.bf16.mxu1 %v594_v0  ;;  %p559_p4 = scmp.ne.s32.totalorder %s355_s4, %s558_s29  ;;  %p564_p6 = scmp.lt.s32.totalorder %s558_s29, %s558_s29 }
  0x54   :  { %400 = vmatmul.mubr.msk.f32.vlgmr.msra.gmra.mrb[0].mxu1 %vm92_vm1, %v80_v10  ;;  %449 = vmatpush3.bf16.msra.mxu0 %v448_v20  ;;  %p565_p7 = por %p564_p6, %p563_p5 }
  0x55   :  { %440 = vmatpush3.bf16.msra.mxu1 %v439_v11  ;;  %410 = vmatprep.mubr.msk.f32.mxu1 %vm595_vm0, %v596_v1 }
  0x56   :  { %441 = vmatprep.subr.bf16.mxu1 %v594_v0  ;;  %450 = vmatprep.subr.bf16.mxu0 %v594_v0  ;;  %p566_p8 = pnand %p565_p7, %p559_p4 }
  0x58   :  { %452 = vmatpush3.bf16.msra.mxu0 %v451_v23 }
  0x59   :  { %443 = vmatpush3.bf16.msra.mxu1 %v442_v14  ;;  %453 = vmatprep.subr.bf16.mxu0 %v594_v0 }
  0x5c   :  { %455 = vmatpush3.bf16.msra.mxu0 %v454_v31 }
 0x127   :  { %v162_v25 = vpop.f32.mrb[0].mxu1 }
 0x128   :  { %v163_v26 = vadd.f32 %v365_v24, %v162_v25  ;;  %v401_v27 = vpop.f32.mrb[1].mxu1 }
 0x12a   :  { %v166_v28 = vmax.f32 %v163_v26, 0.0 }
 0x12c   :  { %411 = vmatmul.mubr.msk.f32.vlgmr.msra.gmra.mrb[2].mxu1 %vm92_vm1, %v166_v28 }
 0x1ff   :  { %v247_v33 = vpop.f32.mrb[2].mxu1 }
 0x200   :  { %v248_v34 = vadd.f32 %v367_v32, %v247_v33  ;;  %v412_v35 = vpop.f32.mrb[3].mxu1 }
 0x202   :  { %v251_v36 = vmax.f32 %v248_v34, 0.0 }
 0x204   :  { %430 = vmatmul.mubr.msk.f32.vlgmr.msra.gmra.mrb[0].mxu0 %vm267_vm2, %v251_v36 }
 0x2d7   :  { %v337_v38 = vpop.f32.mrb[0].mxu0 }
 0x2d8   :  { %v338_v39 = vadd.f32 %v369_v37, %v337_v38  ;;  %v431_v40 = vpop.f32.mrb[1].mxu0 }
 0x2da   :  { %v371_v41 = vmul.f32 -1.442695, %v338_v39 }
 0x2dc   :  { %466 = vpow2.f32 %v371_v41 }
 0x2e6   :  { %v467_v42 = vpop.eup %466 }
 0x2e7   :  { %v344_v43 = vadd.f32 1.0, %v467_v42 }
 0x2e9   :  { %468 = vrcp.f32 %v344_v43 }
 0x2f3   :  { %v469_v44 = vpop.eup %468 }
 0x2f4   :  { %347 = vst [vmem:[#allocation10] sm:$0xff] %v469_v44 }
 0x2f5   :  { %569 = shalt.err (!%p566_p8)
}
 0x2f6   :  { %s570_s8 = scalar_lea.hbm %s728_s7, 128 }
 0x2f7   :  { %p571_p9 = scmp.ne.s32.totalorder %s728_s7, %s570_s8  ;;  %p574_p10 = scmp.lt.u32.totalorder %s570_s8, %s728_s7 }
 0x2f9   :  { %p576_p11 = pnand %p574_p10, %p571_p9 }
 0x2fb   :  { %579 = shalt.err (!%p576_p11)
}
 0x2fc   :  { %357 = dma.vmem_to_hbm [thread:$0]  %s355_s4, 128, %s728_s7, [#allocation4]  }
 0x2fd   :  { %586 = dma.done.wait [#allocation4], 128  }
 0x2fe   :  { %587 = vsyncadd [#allocation4], 4294967168 }
 0x2ff   :  { %361 = vsyncpa [#allocation3], 1 }
 0x300   :  { %362 = vsyncpa [#allocation6], 1 }
 0x301   :  { %363 = vsyncpa [#allocation9], 1 }
 0x302   :  { %364 = vsyncpa [#allocation4], 1 }

</bundles_post_ra>
